<compile_context>
chip_gen: v5e
topology: v5e:2x2
jax: 0.10.0
libtpu: 0.0.40
codegen_flags: <defaults>
</compile_context>

<pallas_src>
import math
import jax
import jax.numpy as jnp
from jax.experimental import pallas as pl
from jax.experimental.pallas import tpu as pltpu

_LANE = 128
_SUBLANE = 8


def _round_up(x, m):
    return ((x + m - 1) // m) * m


def _lstm_cell_kernel(xh_ref, c0_ref, w_ref, b_ref, hc_ref):
    """One LSTM step for a batch tile.

    xh_ref : (Bt, D+H)    bf16  concat([x, h0], axis=-1)
    c0_ref : (Bt, Hp)     f32   previous cell state (lane-padded)
    w_ref  : (D+H, 4*Hp)  bf16  fused [W_ih ; W_hh]^T, lane-dense gate layout
    b_ref  : (1, 4*Hp)    f32   b_ih + b_hh (lane-dense gate layout)
    hc_ref : (Bt, 2*Hp)   f32   output slab [h_new | c_new]
    """
    # Single fused MXU matmul, f32 accumulation.
    gates = jnp.dot(xh_ref[...], w_ref[...],
                    preferred_element_type=jnp.float32) + b_ref[...]

    hp = c0_ref.shape[-1]  # lane-padded hidden size (multiple of 128)
    i_g = jax.nn.sigmoid(gates[:, 0 * hp:1 * hp])
    f_g = jax.nn.sigmoid(gates[:, 1 * hp:2 * hp])
    g_g = jnp.tanh(gates[:, 2 * hp:3 * hp])
    o_g = jax.nn.sigmoid(gates[:, 3 * hp:4 * hp])

    c_new = f_g * c0_ref[...] + i_g * g_g
    h_new = o_g * jnp.tanh(c_new)

    # One wide, lane-dense (multiple of 128) unmasked store.
    hc_ref[...] = jnp.concatenate([h_new, c_new], axis=-1).astype(hc_ref.dtype)


def _lstm_cell(xh, c0, w_cat, bias, *, batch_tile):
    Bp, K = xh.shape
    Hp = w_cat.shape[1] // 4
    grid = (Bp // batch_tile,)

    return pl.pallas_call(
        _lstm_cell_kernel,
        out_shape=jax.ShapeDtypeStruct((Bp, 2 * Hp), jnp.float32),
        grid_spec=pltpu.PrefetchScalarGridSpec(
            num_scalar_prefetch=0,
            grid=grid,
            in_specs=[
                pl.BlockSpec((batch_tile, K), lambda i: (i, 0)),       # xh tile
                pl.BlockSpec((batch_tile, Hp), lambda i: (i, 0)),      # c0 tile
                pl.BlockSpec((K, 4 * Hp), lambda i: (0, 0)),           # weights: resident
                pl.BlockSpec((1, 4 * Hp), lambda i: (0, 0)),           # bias: resident
            ],
            out_specs=pl.BlockSpec((batch_tile, 2 * Hp), lambda i: (i, 0)),
        ),
        compiler_params=pltpu.CompilerParams(
            dimension_semantics=("parallel",),
            vmem_limit_bytes=64 * 1024 * 1024,
        ),
    )(xh, c0, w_cat, bias)


def pack_lstm_params(w_ih, w_hh, b_ih, b_hh, input_dim, hidden_dim):
    """Pack PyTorch-layout LSTM weights into the kernel's fused/lane-dense layout."""
    H = hidden_dim
    Hp = _round_up(H, _LANE)
    # Fused weight (D+H, 4H), PyTorch gate order [i, f, g, o].
    w_cat_t = jnp.concatenate([w_ih, w_hh], axis=1).T   # (D+H, 4H)
    bias = b_ih + b_hh                                  # (4H,)

    # Scatter each gate's H columns into a lane-dense Hp-wide block.
    w_pad = jnp.zeros((input_dim + H, 4 * Hp), jnp.float32)
    b_pad = jnp.zeros((4 * Hp,), jnp.float32)
    for g in range(4):
        w_pad = w_pad.at[:, g * Hp:g * Hp + H].set(w_cat_t[:, g * H:(g + 1) * H])
        b_pad = b_pad.at[g * Hp:g * Hp + H].set(bias[g * H:(g + 1) * H])

    return {
        "w_cat": w_pad.astype(jnp.bfloat16),  # (D+H, 4*Hp) bf16 for native MXU rate
        "bias": b_pad[None, :],               # (1, 4*Hp)   f32
        "input_dim": input_dim,
        "hidden_dim": H,
        "hidden_pad": Hp,
    }


def init_lstm_params(key, input_dim, hidden_dim):
    """Deterministic init matching PyTorch nn.LSTM: uniform(-1/sqrt(H), 1/sqrt(H))."""
    k = 1.0 / math.sqrt(hidden_dim)
    k1, k2, k3, k4 = jax.random.split(key, 4)
    w_ih = jax.random.uniform(k1, (4 * hidden_dim, input_dim), jnp.float32, -k, k)
    w_hh = jax.random.uniform(k2, (4 * hidden_dim, hidden_dim), jnp.float32, -k, k)
    b_ih = jax.random.uniform(k3, (4 * hidden_dim,), jnp.float32, -k, k)
    b_hh = jax.random.uniform(k4, (4 * hidden_dim,), jnp.float32, -k, k)
    params = pack_lstm_params(w_ih, w_hh, b_ih, b_hh, input_dim, hidden_dim)
    # Keep raw f32 copies for the pure-JAX reference check.
    params["_raw"] = (w_ih, w_hh, b_ih, b_hh)
    return params


def lstm_forward(x, params, states=None):
    """Mirrors LSTM.forward: x (B, D) -> out (1, B, H), (h_n (1,B,H), c_n (1,B,H))."""
    B, D = x.shape
    H = params["hidden_dim"]
    Hp = params["hidden_pad"]

    if states is None:
        h0 = jnp.zeros((B, H), jnp.float32)
        c0 = jnp.zeros((B, H), jnp.float32)
    else:
        h0, c0 = states
        h0 = jnp.asarray(h0, jnp.float32).reshape(B, H)
        c0 = jnp.asarray(c0, jnp.float32).reshape(B, H)

    batch_tile = min(256, _round_up(B, _SUBLANE))
    Bp = _round_up(B, batch_tile)

    # Fused activation input, bf16 for the MXU.
    xh = jnp.concatenate([x.astype(jnp.float32), h0], axis=-1)       # (B, D+H)
    xh = jnp.pad(xh, ((0, Bp - B), (0, 0))).astype(jnp.bfloat16)     # (Bp, D+H)
    c0p = jnp.pad(c0, ((0, Bp - B), (0, Hp - H)))                    # (Bp, Hp) f32

    hc = _lstm_cell(xh, c0p, params["w_cat"], params["bias"], batch_tile=batch_tile)

    h_new = hc[:B, :H]
    c_new = hc[:B, Hp:Hp + H]

    out = h_new[None, :, :]                 # seq_len == 1 -> out == h_n
    return out, (h_new[None, :, :], c_new[None, :, :])


def _lstm_reference(x, params, states=None):
    """Pure-JAX f32 reference (PyTorch nn.LSTM semantics, seq_len = 1)."""
    w_ih, w_hh, b_ih, b_hh = params["_raw"]
    B, _ = x.shape
    H = params["hidden_dim"]
    if states is None:
        h0 = jnp.zeros((B, H), jnp.float32)
        c0 = jnp.zeros((B, H), jnp.float32)
    else:
        h0, c0 = states
        h0 = jnp.asarray(h0, jnp.float32).reshape(B, H)
        c0 = jnp.asarray(c0, jnp.float32).reshape(B, H)
    gates = x @ w_ih.T + h0 @ w_hh.T + b_ih + b_hh
    i_g = jax.nn.sigmoid(gates[:, 0 * H:1 * H])
    f_g = jax.nn.sigmoid(gates[:, 1 * H:2 * H])
    g_g = jnp.tanh(gates[:, 2 * H:3 * H])
    o_g = jax.nn.sigmoid(gates[:, 3 * H:4 * H])
    c_new = f_g * c0 + i_g * g_g
    h_new = o_g * jnp.tanh(c_new)
    return h_new, c_new


if __name__ == "__main__":
    key = jax.random.PRNGKey(0)
    B, D, H = 8, 16, 32
    kx, kp = jax.random.split(key)

    x = jax.random.normal(kx, (B, D), jnp.float32)
    params = init_lstm_params(kp, D, H)

    out, (h_n, c_n) = lstm_forward(x, params)
    jax.block_until_ready((out, h_n, c_n))

    assert out.shape == (1, B, H)
    assert h_n.shape == (1, B, H)
    assert c_n.shape == (1, B, H)

    # Correctness check vs. pure-JAX f32 reference (bf16 matmul -> loose tol).
    h_ref, c_ref = _lstm_reference(x, params)
    assert jnp.allclose(h_n[0], h_ref, atol=3e-2, rtol=3e-2)
    assert jnp.allclose(c_n[0], c_ref, atol=3e-2, rtol=3e-2)
    assert jnp.allclose(out[0], h_ref, atol=3e-2, rtol=3e-2)

    print("KERNEL_OK")
</pallas_src>

<mosaic_0001>
module attributes {stable_mosaic.version = 11 : i64} {
  func.func @_lstm_cell_kernel(%arg0: i32, %arg1: memref<8x48xbf16, #tpu.memory_space<vmem>>, %arg2: memref<8x128xf32, #tpu.memory_space<vmem>>, %arg3: memref<48x512xbf16, #tpu.memory_space<vmem>>, %arg4: memref<1x512xf32, #tpu.memory_space<vmem>>, %arg5: memref<8x256xf32, #tpu.memory_space<vmem>>) attributes {dimension_semantics = [#tpu.dimension_semantics<parallel>], iteration_bounds = array<i64: 1>, scalar_prefetch = 0 : i64, scratch_operands = 0 : i64, tpu.core_type = #tpu.core_type<tc>, window_params = [{transform_indices = @transform_0, window_bounds = array<i64: 8, 48>}, {transform_indices = @transform_1, window_bounds = array<i64: 8, 128>}, {pipeline_mode = #tpu.pipeline_mode<synchronous>, transform_indices = @transform_2, window_bounds = array<i64: 48, 512>}, {pipeline_mode = #tpu.pipeline_mode<synchronous>, transform_indices = @transform_3, window_bounds = array<i64: 1, 512>}, {transform_indices = @transform_4, window_bounds = array<i64: 8, 256>}]} {
    %c0 = arith.constant 0 : index
    %c0_0 = arith.constant 0 : index
    %0 = vector.load %arg1[%c0, %c0_0] : memref<8x48xbf16, #tpu.memory_space<vmem>>, vector<8x48xbf16>
    %c0_1 = arith.constant 0 : index
    %c0_2 = arith.constant 0 : index
    %1 = vector.load %arg3[%c0_1, %c0_2] : memref<48x512xbf16, #tpu.memory_space<vmem>>, vector<48x512xbf16>
    %cst = arith.constant dense<0.000000e+00> : vector<8x512xf32>
    %2 = tpu.matmul %0, %1, %cst {dimension_numbers = #tpu.dot_dimension_numbers<[1], [0], [0], [1], [0, 0, 1, 1], [], []>} : vector<8x48xbf16>, vector<48x512xbf16>, vector<8x512xf32> -> vector<8x512xf32>
    %c0_3 = arith.constant 0 : index
    %c0_4 = arith.constant 0 : index
    %3 = vector.load %arg4[%c0_3, %c0_4] : memref<1x512xf32, #tpu.memory_space<vmem>>, vector<1x512xf32>
    %4 = vector.broadcast %3 : vector<1x512xf32> to vector<8x512xf32>
    %5 = arith.addf %2, %4 : vector<8x512xf32>
    %6 = vector.extract_strided_slice %5 {offsets = [0, 0], sizes = [8, 128], strides = [1, 1]} : vector<8x512xf32> to vector<8x128xf32>
    %7 = arith.negf %6 : vector<8x128xf32>
    %8 = math.exp %7 : vector<8x128xf32>
    %cst_5 = arith.constant 1.000000e+00 : f32
    %9 = vector.broadcast %cst_5 : f32 to vector<8x128xf32>
    %10 = arith.addf %9, %8 : vector<8x128xf32>
    %11 = arith.divf %9, %10 : vector<8x128xf32>
    %12 = vector.extract_strided_slice %5 {offsets = [0, 128], sizes = [8, 128], strides = [1, 1]} : vector<8x512xf32> to vector<8x128xf32>
    %13 = arith.negf %12 : vector<8x128xf32>
    %14 = math.exp %13 : vector<8x128xf32>
    %cst_6 = arith.constant 1.000000e+00 : f32
    %15 = vector.broadcast %cst_6 : f32 to vector<8x128xf32>
    %16 = arith.addf %15, %14 : vector<8x128xf32>
    %17 = arith.divf %15, %16 : vector<8x128xf32>
    %18 = vector.extract_strided_slice %5 {offsets = [0, 256], sizes = [8, 128], strides = [1, 1]} : vector<8x512xf32> to vector<8x128xf32>
    %19 = math.tanh %18 : vector<8x128xf32>
    %20 = vector.extract_strided_slice %5 {offsets = [0, 384], sizes = [8, 128], strides = [1, 1]} : vector<8x512xf32> to vector<8x128xf32>
    %21 = arith.negf %20 : vector<8x128xf32>
    %22 = math.exp %21 : vector<8x128xf32>
    %cst_7 = arith.constant 1.000000e+00 : f32
    %23 = vector.broadcast %cst_7 : f32 to vector<8x128xf32>
    %24 = arith.addf %23, %22 : vector<8x128xf32>
    %25 = arith.divf %23, %24 : vector<8x128xf32>
    %c0_8 = arith.constant 0 : index
    %c0_9 = arith.constant 0 : index
    %26 = vector.load %arg2[%c0_8, %c0_9] : memref<8x128xf32, #tpu.memory_space<vmem>>, vector<8x128xf32>
    %27 = arith.mulf %17, %26 : vector<8x128xf32>
    %28 = arith.mulf %11, %19 : vector<8x128xf32>
    %29 = arith.addf %27, %28 : vector<8x128xf32>
    %30 = math.tanh %29 : vector<8x128xf32>
    %31 = arith.mulf %25, %30 : vector<8x128xf32>
    %32 = tpu.concatenate %31, %29 in 1 : vector<8x128xf32>, vector<8x128xf32> -> vector<8x256xf32>
    %c0_10 = arith.constant 0 : index
    %c0_11 = arith.constant 0 : index
    %33 = vector.load %arg5[%c0_10, %c0_11] : memref<8x256xf32, #tpu.memory_space<vmem>>, vector<8x256xf32>
    tpu.vector_store %arg5[%c0_10, %c0_11], %32 {strides = array<i32>} : memref<8x256xf32, #tpu.memory_space<vmem>>, vector<8x256xf32>,
    return
  }
  func.func @transform_0(%arg0: i32) -> (i32, i32) {
    %c0_i32 = arith.constant 0 : i32
    %c0_i32_0 = arith.constant 0 : i32
    return %arg0, %c0_i32 : i32, i32
  }
  func.func @transform_1(%arg0: i32) -> (i32, i32) {
    %c0_i32 = arith.constant 0 : i32
    %c0_i32_0 = arith.constant 0 : i32
    return %arg0, %c0_i32 : i32, i32
  }
  func.func @transform_2(%arg0: i32) -> (i32, i32) {
    %c0_i32 = arith.constant 0 : i32
    %c0_i32_0 = arith.constant 0 : i32
    %c0_i32_1 = arith.constant 0 : i32
    return %c0_i32, %c0_i32_0 : i32, i32
  }
  func.func @transform_3(%arg0: i32) -> (i32, i32) {
    %c0_i32 = arith.constant 0 : i32
    %c0_i32_0 = arith.constant 0 : i32
    %c0_i32_1 = arith.constant 0 : i32
    return %c0_i32, %c0_i32_0 : i32, i32
  }
  func.func @transform_4(%arg0: i32) -> (i32, i32) {
    %c0_i32 = arith.constant 0 : i32
    %c0_i32_0 = arith.constant 0 : i32
    return %arg0, %c0_i32 : i32, i32
  }
}

</mosaic_0001>

<bundles_post_ra>
// kernel: tpu_custom_call.1
= control target key start
LH: loop header
LB: loop body
LE: loop exit
PB: predicated region body
PF: predicated region fallthrough
CT: control target
= control target key end

     0   :  { %9 = vsyncpa [#allocation3], 0  ;;  %s565_s0 = inlined_call_operand.hbm [shape: bf16[8,48], index: 0, kind: input, shape index: {}]   ;;  %s566_s1 = inlined_call_operand.hbm [shape: f32[8,128], index: 1, kind: input, shape index: {}]   ;;  %s567_s2 = inlined_call_operand.hbm [shape: bf16[48,512], index: 2, kind: input, shape index: {}]   ;;  %s568_s3 = inlined_call_operand.hbm [shape: f32[1,512], index: 3, kind: input, shape index: {}]   ;;  %s569_s4 = inlined_call_operand.hbm [shape: f32[8,256], index: 4, kind: output, shape index: {}]  }
   0x1   :  { %10 = vsyncpa [#allocation6], 0 }
   0x2   :  { %11 = vsyncpa [#allocation9], 0  ;;  %s29_s17 = sshll.u32 %s566_s1, 4  ;;  %s30_s17 = int_to_ptr.hbm [resolvable:$true] %s29_s17 }
   0x3   :  { %12 = vsyncpa [#allocation4], 0  ;;  %s518_s18 = smov [#allocation5]   ;;  %s18_s22 = sshll.u32 %s565_s0, 4  ;;  %s19_s22 = int_to_ptr.hbm [resolvable:$true] %s18_s22 }
   0x4   :  { %s31_s19 = sshll.u32 %s518_s18, 4  ;;  %s519_s23 = smov [#allocation2]   ;;  %s32_s19 = int_to_ptr.vmem [resolvable:$true] %s31_s19 }
   0x5   :  { %34 = dma.hbm_to_vmem [thread:$0]  %s30_s17, 128, %s32_s19, [#allocation6]  }
   0x6   :  { %s20_s24 = sshll.u32 %s519_s23, 4  ;;  %s39_s27 = sshll.u32 %s567_s2, 4  ;;  %s21_s24 = int_to_ptr.vmem [resolvable:$true] %s20_s24  ;;  %s40_s27 = int_to_ptr.hbm [resolvable:$true] %s39_s27 }
   0x7   :  { %23 = dma.hbm_to_vmem [thread:$0]  %s19_s22, 64, %s21_s24, [#allocation3]  }
   0x8   :  { %s520_s1 = smov [#allocation7]   ;;  %s53_s5 = sshll.u32 %s568_s3, 4  ;;  %s54_s5 = int_to_ptr.hbm [resolvable:$true] %s53_s5 }
   0x9   :  { %s41_s28 = sshll.u32 %s520_s1, 4  ;;  %s521_s6 = smov 256   ;;  %s42_s28 = int_to_ptr.vmem [resolvable:$true] %s41_s28 }
   0xa   :  { %s522_s0 = smov 16   ;;  %s523_s7 = smov [#allocation8]  }
   0xb   :  { %47 = dma.hbm_to_vmem [thread:$0]  %s40_s27, 1536, %s42_s28, [#allocation6], %s521_s6, %s521_s6, %s522_s0  }
   0xc   :  { %s55_s8 = sshll.u32 %s523_s7, 4  ;;  %s56_s8 = int_to_ptr.vmem [resolvable:$true] %s55_s8 }
   0xd   :  { %58 = dma.hbm_to_vmem [thread:$0]  %s54_s5, 64, %s56_s8, [#allocation9]  }
   0xe   :  { %510 = dma.done.wait [#allocation3], 64  }
   0xf   :  { %511 = vsyncadd [#allocation3], 4294967232 }
  0x10   :  { %512 = dma.done.wait [#allocation6], 1664  }
  0x11   :  { %513 = vsyncadd [#allocation6], 4294965632 }
  0x12   :  { %514 = dma.done.wait [#allocation9], 64  }
  0x13   :  { %515 = vsyncadd [#allocation9], 4294967232  ;;  %v334_v0 = vld [vmem:[#allocation7 + $0x40] sm:$0xf]  ;;  %v365_v1 = vld [vmem:[#allocation7 + $0x4c] sm:$0xf0] }
  0x14   :  { %v363_v2 = vld [vmem:[#allocation7 + $0x44] sm:$0xf]  ;;  %v335_v3 = vor.u32 %v365_v1, %v334_v0  ;;  %v336_v4 = vld [vmem:[#allocation7 + $0x50] sm:$0xf0]  ;;  %v364_v5 = vld [vmem:[#allocation7 + $0x4c] sm:$0xf] }
  0x15   :  { %v344_v6 = vld [vmem:[#allocation7 + $0x58] sm:$0xf0]  ;;  %v339_v7 = vor.u32 %v363_v2, %v336_v4  ;;  %v318_v9 = vld [vmem:[#allocation7 + $0x20] sm:$0xf]  ;;  %v361_v10 = vld [vmem:[#allocation7 + $0x2c] sm:$0xf0] }
  0x16   :  { %v347_v8 = vor.u32 %v364_v5, %v344_v6  ;;  %v359_v11 = vld [vmem:[#allocation7 + $0x24] sm:$0xf]  ;;  %168 = vmatpush.bf16.msra.mxu0 %v335_v3  ;;  %v319_v12 = vor.u32 %v361_v10, %v318_v9  ;;  %v320_v13 = vld [vmem:[#allocation7 + $0x30] sm:$0xf0]  ;;  %v360_v14 = vld [vmem:[#allocation7 + $0x2c] sm:$0xf] }
  0x17   :  { %v328_v15 = vld [vmem:[#allocation7 + $0x38] sm:$0xf0]  ;;  %181 = vmatpush.bf16.msra.mxu1 %v339_v7  ;;  %v323_v16 = vor.u32 %v359_v11, %v320_v13  ;;  %v342_v18 = vld [vmem:[#allocation7 + $0x48] sm:$0xf]  ;;  %v366_v19 = vld [vmem:[#allocation7 + $0x54] sm:$0xf0] }
  0x18   :  { %207 = vmatpush.bf16.msra.mxu3 %v347_v8  ;;  %v331_v17 = vor.u32 %v360_v14, %v328_v15  ;;  %v302_v20 = vld [vmem:[#allocation7] sm:$0xf]  ;;  %v343_v21 = vor.u32 %v366_v19, %v342_v18  ;;  %v357_v22 = vld [vmem:[#allocation7 + $0xc] sm:$0xf0]  ;;  %v355_v23 = vld [vmem:[#allocation7 + $0x4] sm:$0xf] }
  0x19   :  { %v304_v24 = vld [vmem:[#allocation7 + $0x10] sm:$0xf0]  ;;  %v356_v25 = vld [vmem:[#allocation7 + $0xc] sm:$0xf]  ;;  %v312_v26 = vld [vmem:[#allocation7 + $0x18] sm:$0xf0]  ;;  %v303_v27 = vor.u32 %v357_v22, %v302_v20 }
  0x1a   :  { %169 = vmatpush.bf16.msra.mxu0 %v319_v12  ;;  %194 = vmatpush.bf16.msra.mxu2 %v343_v21  ;;  %v326_v28 = vld [vmem:[#allocation7 + $0x28] sm:$0xf]  ;;  %v362_v29 = vld [vmem:[#allocation7 + $0x34] sm:$0xf0]  ;;  %v307_v30 = vor.u32 %v355_v23, %v304_v24  ;;  %v315_v31 = vor.u32 %v356_v25, %v312_v26  ;;  %v76_v35 = vld [vmem:[#allocation2] sm:$0xf] }
  0x1b   :  { %182 = vmatpush.bf16.msra.mxu1 %v323_v16  ;;  %v327_v32 = vor.u32 %v362_v29, %v326_v28  ;;  %v310_v33 = vld [vmem:[#allocation7 + $0x8] sm:$0xf]  ;;  %v358_v34 = vld [vmem:[#allocation7 + $0x14] sm:$0xf0]  ;;  %vm159_vm0 = vcmask 392192   ;;  %s524_s2 = smov [#allocation10]  }
  0x1c   :  { %208 = vmatpush.bf16.msra.mxu3 %v331_v17  ;;  %v311_v36 = vor.u32 %v358_v34, %v310_v33  ;;  %v89_v37 = vld [vmem:[#allocation8] sm:$0xf]  ;;  %v273_v19 = vld [vmem:[#allocation5] sm:$0xff]  ;;  %s286_s3 = sshll.u32 %s524_s2, 4  ;;  %s288_s11 = sshll.u32 %s569_s4, 4  ;;  %s287_s3 = int_to_ptr.vmem [resolvable:$true] %s286_s3  ;;  %s289_s11 = int_to_ptr.hbm [resolvable:$true] %s288_s11 }
  0x1d   :  { %v91_v38 = vperm.slane %v89_v37, 0  ;;  %v92_v39 = vperm.slane %v89_v37, 1  ;;  %v94_v46 = vperm.slane %v89_v37, 3  ;;  %v93_v57 = vperm.slane %v89_v37, 2 }
  0x1e   :  { %170 = vmatpush.bf16.msra.mxu0 %v303_v27  ;;  %195 = vmatpush.bf16.msra.mxu2 %v327_v32 }
  0x1f   :  { %183 = vmatpush.bf16.msra.mxu1 %v307_v30 }
  0x20   :  { %209 = vmatpush.bf16.msra.mxu3 %v315_v31 }
  0x21   :  { %348 = vmatmul.msk.bf16.vlgmr.msra.gmra.mxu0 %vm159_vm0, %v76_v35 }
  0x22   :  { %349 = vmatmul.msk.bf16.vlgmr.msra.gmra.mxu1 %vm159_vm0, %v76_v35  ;;  %196 = vmatpush.bf16.msra.mxu2 %v311_v36 }
  0x23   :  { %351 = vmatmul.msk.bf16.vlgmr.msra.gmra.mxu3 %vm159_vm0, %v76_v35 }
  0x25   :  { %350 = vmatmul.msk.bf16.vlgmr.msra.gmra.mxu2 %vm159_vm0, %v76_v35 }
  0x9e   :  { %v172_v40 = vpop.f32.mrf.mxu0 }
  0x9f   :  { %v173_v41 = vadd.f32 %v172_v40, %v91_v38  ;;  %v185_v42 = vpop.f32.mrf.mxu1 }
  0xa0   :  { %v186_v43 = vadd.f32 %v185_v42, %v92_v39 }
  0xa1   :  { %v352_v44 = vmul.f32 -1.442695, %v173_v41 }
  0xa2   :  { %v353_v45 = vmul.f32 -1.442695, %v186_v43 }
  0xa3   :  { %374 = vpow2.f32 %v352_v44 }
  0xa4   :  { %376 = vpow2.f32 %v353_v45 }
  0xa6   :  { %v211_v47 = vpop.f32.mrf.mxu3  ;;  %v174_v49 = vpop.f32.mrf.mxu0 }
  0xa7   :  { %v212_v48 = vadd.f32 %v211_v47, %v94_v46  ;;  %v187_v50 = vpop.f32.mrf.mxu1 }
  0xa8   :  { %v198_v53 = vpop.f32.mrf.mxu2 }
  0xa9   :  { %v354_v51 = vmul.f32 -1.442695, %v212_v48  ;;  %v375_v52 = vpop.eup %374  ;;  %v199_v60 = vadd.f32 %v198_v53, %v93_v57 }
  0xaa   :  { %v377_v54 = vpop.eup %376  ;;  %v218_v55 = vadd.f32 1.0, %v375_v52 }
  0xab   :  { %378 = vpow2.f32 %v354_v51  ;;  %v237_v56 = vadd.f32 1.0, %v377_v54 }
  0xac   :  { %380 = vrcp.f32 %v218_v55  ;;  %v230_v5 = vand.u32 2147483648, %v218_v55  ;;  %v228_v7 = vand.u32 2147483647, %v218_v55  ;;  %vm224_vm3 = vweird.f32 %v218_v55 }
  0xad   :  { %382 = vrcp.f32 %v237_v56  ;;  %v249_v8 = vand.u32 2147483648, %v237_v56  ;;  %v247_v10 = vand.u32 2147483647, %v237_v56  ;;  %vm243_vm4 = vweird.f32 %v237_v56 }
  0xae   :  { %v213_v58 = vpop.f32.mrf.mxu3  ;;  %v231_v15 = vor.u32 1.1754944e-38, %v230_v5  ;;  %vm229_vm6 = vcmp.eq.f32.partialorder %v228_v7, 8.507059e+37 }
  0xaf   :  { %v250_v18 = vor.u32 1.1754944e-38, %v249_v8  ;;  %vm248_vm8 = vcmp.eq.f32.partialorder %v247_v10, 8.507059e+37 }
  0xb0   :  { %v200_v62 = vpop.f32.mrf.mxu2 }
  0xb1   :  { %v379_v59 = vpop.eup %378 }
  0xb2   :  { %v257_v61 = vadd.f32 1.0, %v379_v59  ;;  %v381_v63 = vpop.eup %380 }
  0xb3   :  { %v383_v0 = vpop.eup %382  ;;  %v220_v1 = vmul.f32 %v381_v63, %v218_v55  ;;  %vm225_vm1 = vweird.f32 %v381_v63 }
  0xb4   :  { %384 = vrcp.f32 %v257_v61  ;;  %v239_v2 = vmul.f32 %v383_v0, %v237_v56  ;;  %vm244_vm2 = vweird.f32 %v383_v0  ;;  %vm226_vm5 = vmor %vm224_vm3, %vm225_vm1  ;;  %v269_v29 = vand.u32 2147483648, %v257_v61 }
  0xb5   :  { %386 = vtanh.f32 %v199_v60  ;;  %v221_v3 = vsub.f32 1.0, %v220_v1  ;;  %vm245_vm7 = vmor %vm243_vm4, %vm244_vm2  ;;  %vm263_vm10 = vweird.f32 %v257_v61  ;;  %v267_v30 = vand.u32 2147483647, %v257_v61 }
  0xb6   :  { %v240_v4 = vsub.f32 1.0, %v239_v2  ;;  %v270_v32 = vor.u32 1.1754944e-38, %v269_v29 }
  0xb7   :  { %v222_v6 = vmul.f32 %v381_v63, %v221_v3  ;;  %vm268_vm12 = vcmp.eq.f32.partialorder %v267_v30, 8.507059e+37 }
  0xb8   :  { %v241_v9 = vmul.f32 %v383_v0, %v240_v4 }
  0xb9   :  { %v223_v12 = vadd.f32 %v381_v63, %v222_v6 }
  0xba   :  { %v385_v11 = vpop.eup %384  ;;  %v242_v16 = vadd.f32 %v383_v0, %v241_v9 }
  0xbb   :  { %v387_v13 = vpop.eup %386  ;;  %v259_v14 = vmul.f32 %v385_v11, %v257_v61  ;;  %v227_v17 = vsel %vm226_vm5, %v381_v63, %v223_v12  ;;  %vm264_vm9 = vweird.f32 %v385_v11 }
  0xbc   :  { %v232_v21 = vsel %vm229_vm6, %v231_v15, %v227_v17  ;;  %v246_v22 = vsel %vm245_vm7, %v383_v0, %v242_v16  ;;  %vm265_vm11 = vmor %vm263_vm10, %vm264_vm9 }
  0xbd   :  { %v260_v20 = vsub.f32 1.0, %v259_v14  ;;  %v275_v23 = vmul.f32 %v387_v13, %v232_v21  ;;  %v251_v24 = vsel %vm248_vm8, %v250_v18, %v246_v22 }
  0xbe   :  { %v274_v26 = vmul.f32 %v273_v19, %v251_v24 }
  0xbf   :  { %v261_v25 = vmul.f32 %v385_v11, %v260_v20 }
  0xc0   :  { %v276_v27 = vadd.f32 %v275_v23, %v274_v26 }
  0xc1   :  { %v262_v28 = vadd.f32 %v385_v11, %v261_v25 }
  0xc2   :  { %388 = vtanh.f32 %v276_v27  ;;  %280 = vst [vmem:[#allocation10 + $0x8] sm:$0xff] %v276_v27 }
  0xc3   :  { %v266_v31 = vsel %vm265_vm11, %v385_v11, %v262_v28 }
  0xc4   :  { %v271_v34 = vsel %vm268_vm12, %v270_v32, %v266_v31 }
  0xc8   :  { %v389_v33 = vpop.eup %388 }
  0xc9   :  { %v278_v35 = vmul.f32 %v389_v33, %v271_v34 }
  0xcb   :  { %279 = vst [vmem:[#allocation10] sm:$0xff] %v278_v35 }
  0xcc   :  { %291 = dma.vmem_to_hbm [thread:$0]  %s287_s3, 256, %s289_s11, [#allocation4]  }
  0xcd   :  { %516 = dma.done.wait [#allocation4], 256  }
  0xce   :  { %517 = vsyncadd [#allocation4], 4294967040 }
  0xcf   :  { %296 = vsyncpa [#allocation3], 1 }
  0xd0   :  { %297 = vsyncpa [#allocation6], 1 }
  0xd1   :  { %298 = vsyncpa [#allocation9], 1 }
  0xd2   :  { %299 = vsyncpa [#allocation4], 1 }

</bundles_post_ra>
